<compile_context>
chip_gen: v6e
topology: v6e:2x2x1
jax: 0.10.0
libtpu: 0.0.40
codegen_flags: <defaults>
</compile_context>

<pallas_src>
import jax
import jax.numpy as jnp
from jax.experimental import pallas as pl
from jax.experimental.pallas import tpu as pltpu


def _round_up(x, m):
    return (x + m - 1) // m * m


def _vmem_capacity_bytes():
    """Physical VMEM on the current chip (conservative 64 MiB fallback = v7x)."""
    try:
        cap = int(getattr(pltpu.get_tpu_info(), "vmem_capacity_bytes", 0))
        if cap > 0:
            return cap
    except Exception:
        pass
    return 64 << 20


def _num_output_splits():
    """2 on chips with 2 TensorCores (v7x) so the 'parallel' grid axis shards
    output columns across cores; 1 elsewhere (splitting output columns on a
    single-TC chip would only refetch W1)."""
    try:
        kind = str(jax.devices()[0].device_kind).lower()
        if "v7" in kind or "7x" in kind:
            return 2
    except Exception:
        pass
    return 1


def _quantize_int8(w):
    """Symmetric per-output-column int8 quantization.
    w: [in, out] f32 -> (w_q int8 [in, out], scale f32 [out])."""
    amax = jnp.max(jnp.abs(w), axis=0)                        # [out]
    scale = jnp.where(amax > 0, amax / 127.0, 1.0)
    w_q = jnp.clip(jnp.round(w / scale[None, :]), -127, 127).astype(jnp.int8)
    return w_q, scale.astype(jnp.float32)


def mask_kernel(x_ref, w1_ref, p1_ref, w2_ref, p2_ref, o_ref):
    """One (n, k) grid step: Linear1+ReLU+BN on K tile k, partial Linear2 into
    output-column tile n.  o_ref is the resident f32 accumulator over k."""
    k = pl.program_id(1)

    @pl.when(k == 0)
    def _init():
        o_ref[...] = jnp.zeros_like(o_ref)

    # ---- fcl_input: Linear + ReLU for this K tile (MXU + VPU). ----
    # int8 weight values are exact in bf16; per-column scale folded into f32.
    h = jnp.dot(x_ref[...], w1_ref[...].astype(jnp.bfloat16),
                preferred_element_type=jnp.float32)            # [B, tk] f32
    b1 = p1_ref[0:1, :]
    gamma = p1_ref[1:2, :]
    beta = p1_ref[2:3, :]
    s1 = p1_ref[3:4, :]
    h = jnp.maximum(h * s1 + b1, 0.0)

    # ---- BatchNorm1d (training mode, biased variance), two-pass stats. ----
    inv_b = 1.0 / h.shape[0]
    mean = jnp.sum(h, axis=0, keepdims=True) * inv_b
    d = h - mean
    var = jnp.sum(d * d, axis=0, keepdims=True) * inv_b
    h_norm = d * (gamma * jax.lax.rsqrt(var + 1e-5)) + beta

    # ---- fcl_out Linear: accumulate this K tile's contribution (MXU). ----
    s2 = p2_ref[1:2, :]
    o_ref[...] += s2 * jnp.dot(h_norm.astype(jnp.bfloat16),
                               w2_ref[...].astype(jnp.bfloat16),
                               preferred_element_type=jnp.float32)

    # ---- finalize in place: bias + exact sigmoid. ----
    @pl.when(k == pl.num_programs(1) - 1)
    def _finalize():
        y = o_ref[...] + p2_ref[0:1, :]
        o_ref[...] = 1.0 / (1.0 + jnp.exp(-y))


def mask_forward(x, w1, b1, gamma, beta, w2, b2, *, tk=None, n_split=None):
    """x: [B, F_in] f32. w1: [F_in, F_inner], w2: [F_inner, F_in] (pre-transposed).
    Returns [B, F_in] f32 matching PyTorch Mask.forward (training-mode BN)."""
    B, F_in = x.shape
    F_inner = w1.shape[1]

    if n_split is None:
        n_split = _num_output_splits()
    vmem_cap = _vmem_capacity_bytes()

    # --- lane padding: output features to a multiple of 128*n_split so every
    # parallel output tile is lane-dense; inner features to multiples of tk ---
    F_in_p = _round_up(F_in, 128 * n_split)
    tn = F_in_p // n_split
    F_inner_p = _round_up(F_inner, 128)
    if tk is None:
        # Big K tiles (fewer ~0.35us grid steps); roomier on 128 MiB chips.
        tk = min(F_inner_p, 2048 if vmem_cap >= (100 << 20) else 1024)
    tk = _round_up(min(tk, F_inner_p), 128)
    F_inner_p = _round_up(F_inner_p, tk)
    n_k = F_inner_p // tk

    # --- int8 per-output-channel weight quantization (halves weight DMA vs
    # bf16 on this HBM-bound kernel); scales ride with the small vector params ---
    w1_q, s1 = _quantize_int8(w1)
    w2_q, s2 = _quantize_int8(w2)

    def pad2(a, r, c):
        return jnp.pad(a, ((0, r - a.shape[0]), (0, c - a.shape[1])))

    x_p = pad2(x, B, F_in_p).astype(jnp.bfloat16)
    w1_p = pad2(w1_q, F_in_p, F_inner_p)                              # int8
    w2_p = pad2(w2_q, F_inner_p, F_in_p)                              # int8
    p1 = pad2(jnp.stack([b1, gamma, beta, s1], axis=0).astype(jnp.float32),
              4, F_inner_p)                                           # b1/g/beta/s1
    p2 = pad2(jnp.stack([b2, s2], axis=0).astype(jnp.float32),
              2, F_in_p)                                              # b2/s2

    # --- VMEM budget from the actual (double-buffered) tiles; fail loudly if
    # it does not fit the current generation instead of silently clamping ---
    vmem_bytes = (
        2 * B * F_in_p * 2          # x bf16 (resident; budget as double-buffered)
        + 2 * F_in_p * tk * 1       # W1 int8 column tile
        + 2 * 8 * tk * 4            # p1 (sublane-padded)
        + 2 * tk * tn * 1           # W2 int8 tile
        + 2 * 8 * tn * 4            # p2 (sublane-padded)
        + 2 * B * tn * 4            # output block (resident f32 accumulator)
    )
    vmem_limit = max(int(vmem_bytes * 1.5) + (1 << 20), 4 << 20)
    if vmem_limit > int(vmem_cap * 0.9):
        raise ValueError(
            f"Mask kernel tiles need ~{vmem_bytes / 2**20:.1f} MiB VMEM, which "
            f"does not fit this chip ({vmem_cap / 2**20:.0f} MiB). Reduce tk "
            "or tile the batch (requires two-pass BN).")
    # TODO(synk): if B*F ever outgrows VMEM, batch-tile with a two-pass BN
    # (stats pass, then normalize pass) instead of this resident-batch design.

    out = pl.pallas_call(
        mask_kernel,
        out_shape=jax.ShapeDtypeStruct((B, F_in_p), jnp.float32),
        grid_spec=pltpu.PrefetchScalarGridSpec(
            num_scalar_prefetch=0,
            grid=(n_split, n_k),
            in_specs=[
                pl.BlockSpec((B, F_in_p), lambda n, k: (0, 0)),    # x (resident)
                pl.BlockSpec((F_in_p, tk), lambda n, k: (0, k)),   # W1 col tile
                pl.BlockSpec((4, tk), lambda n, k: (0, k)),        # b1/gamma/beta/s1
                pl.BlockSpec((tk, tn), lambda n, k: (k, n)),       # W2 tile
                pl.BlockSpec((2, tn), lambda n, k: (0, n)),        # b2/s2
            ],
            out_specs=pl.BlockSpec((B, tn), lambda n, k: (0, n)),
        ),
        compiler_params=pltpu.CompilerParams(
            dimension_semantics=("parallel", "arbitrary"),
            vmem_limit_bytes=vmem_limit,
        ),
    )(x_p, w1_p, p1, w2_p, p2)

    return out[:, :F_in]


def init_params(key, num_input_features, num_inner_features):
    """Deterministic init mimicking PyTorch nn.Linear default U(-1/sqrt(fan_in), +)."""
    k1, k2, k3, k4 = jax.random.split(key, 4)
    bound1 = 1.0 / jnp.sqrt(num_input_features)
    bound2 = 1.0 / jnp.sqrt(num_inner_features)
    # stored pre-transposed: [in, out]
    w1 = jax.random.uniform(k1, (num_input_features, num_inner_features),
                            jnp.float32, -bound1, bound1)
    b1 = jax.random.uniform(k2, (num_inner_features,), jnp.float32, -bound1, bound1)
    w2 = jax.random.uniform(k3, (num_inner_features, num_input_features),
                            jnp.float32, -bound2, bound2)
    b2 = jax.random.uniform(k4, (num_input_features,), jnp.float32, -bound2, bound2)
    gamma = jnp.ones((num_inner_features,), jnp.float32)   # BatchNorm1d weight
    beta = jnp.zeros((num_inner_features,), jnp.float32)   # BatchNorm1d bias
    return w1, b1, gamma, beta, w2, b2


if __name__ == "__main__":
    # Small shapes consistent with the module (original: 1096 -> 2048 -> 1096).
    # F_IN=250 deliberately not a multiple of 128 to exercise the padding path;
    # tk=256 forces a 2-step K grid to exercise the resident-output accumulation.
    B, F_IN, F_INNER = 8, 250, 512

    key = jax.random.PRNGKey(0)
    kx, kp = jax.random.split(key)
    x = jax.random.normal(kx, (B, F_IN), jnp.float32)
    w1, b1, gamma, beta, w2, b2 = init_params(kp, F_IN, F_INNER)

    out = mask_forward(x, w1, b1, gamma, beta, w2, b2, tk=256)
    jax.block_until_ready(out)

    # Pure-JAX f32 reference (training-mode BatchNorm1d). Kernel uses bf16
    # activations and int8 per-channel weights, so tolerance is relaxed.
    h = jnp.maximum(x @ w1 + b1, 0.0)
    mean = h.mean(axis=0, keepdims=True)
    var = ((h - mean) ** 2).mean(axis=0, keepdims=True)
    hn = (h - mean) / jnp.sqrt(var + 1e-5) * gamma + beta
    ref = jax.nn.sigmoid(hn @ w2 + b2)
    assert out.shape == ref.shape, "shape mismatch vs reference"
    assert jnp.allclose(out, ref, atol=2e-2, rtol=0.0), (
        "mismatch vs reference, max abs err = "
        f"{float(jnp.max(jnp.abs(out - ref)))}")

    print("KERNEL_OK")
</pallas_src>

<mosaic_0001>
module attributes {stable_mosaic.version = 11 : i64} {
  func.func @mask_kernel(%arg0: i32, %arg1: i32, %arg2: memref<8x256xbf16, #tpu.memory_space<vmem>>, %arg3: memref<256x256xi8, #tpu.memory_space<vmem>>, %arg4: memref<4x256xf32, #tpu.memory_space<vmem>>, %arg5: memref<256x256xi8, #tpu.memory_space<vmem>>, %arg6: memref<2x256xf32, #tpu.memory_space<vmem>>, %arg7: memref<8x256xf32, #tpu.memory_space<vmem>>) attributes {dimension_semantics = [#tpu.dimension_semantics<parallel>, #tpu.dimension_semantics<arbitrary>], iteration_bounds = array<i64: 1, 2>, scalar_prefetch = 0 : i64, scratch_operands = 0 : i64, tpu.core_type = #tpu.core_type<tc>, window_params = [{pipeline_mode = #tpu.pipeline_mode<synchronous>, transform_indices = @transform_0, window_bounds = array<i64: 8, 256>}, {transform_indices = @transform_1, window_bounds = array<i64: 256, 256>}, {transform_indices = @transform_2, window_bounds = array<i64: 4, 256>}, {transform_indices = @transform_3, window_bounds = array<i64: 256, 256>}, {transform_indices = @transform_4, window_bounds = array<i64: 2, 256>}, {transform_indices = @transform_5, window_bounds = array<i64: 8, 256>}]} {
    %c0_i32 = arith.constant 0 : i32
    %0 = arith.cmpi eq, %arg1, %c0_i32 : i32
    %1 = arith.extui %0 : i1 to i32
    %c0_i32_0 = arith.constant 0 : i32
    %2 = arith.cmpi ne, %1, %c0_i32_0 : i32
    scf.if %2 {
      %cst_25 = arith.constant 0.000000e+00 : f32
      %49 = vector.broadcast %cst_25 : f32 to vector<8x256xf32>
      %c0_26 = arith.constant 0 : index
      %c0_27 = arith.constant 0 : index
      %50 = vector.load %arg7[%c0_26, %c0_27] : memref<8x256xf32, #tpu.memory_space<vmem>>, vector<8x256xf32>
      tpu.vector_store %arg7[%c0_26, %c0_27], %49 {strides = array<i32>} : memref<8x256xf32, #tpu.memory_space<vmem>>, vector<8x256xf32>,
    } else {
    }
    %c0 = arith.constant 0 : index
    %c0_1 = arith.constant 0 : index
    %3 = vector.load %arg2[%c0, %c0_1] : memref<8x256xbf16, #tpu.memory_space<vmem>>, vector<8x256xbf16>
    %c0_2 = arith.constant 0 : index
    %c0_3 = arith.constant 0 : index
    %4 = vector.load %arg3[%c0_2, %c0_3] : memref<256x256xi8, #tpu.memory_space<vmem>>, vector<256x256xi8>
    %5 = arith.sitofp %4 : vector<256x256xi8> to vector<256x256xbf16>
    %cst = arith.constant dense<0.000000e+00> : vector<8x256xf32>
    %6 = tpu.matmul %3, %5, %cst {dimension_numbers = #tpu.dot_dimension_numbers<[1], [0], [0], [1], [0, 0, 1, 1], [], []>} : vector<8x256xbf16>, vector<256x256xbf16>, vector<8x256xf32> -> vector<8x256xf32>
    %c0_4 = arith.constant 0 : index
    %c0_5 = arith.constant 0 : index
    %7 = vector.load %arg4[%c0_4, %c0_5] : memref<4x256xf32, #tpu.memory_space<vmem>>, vector<1x256xf32>
    %c1 = arith.constant 1 : index
    %c0_6 = arith.constant 0 : index
    %8 = vector.load %arg4[%c1, %c0_6] : memref<4x256xf32, #tpu.memory_space<vmem>>, vector<1x256xf32>
    %c2 = arith.constant 2 : index
    %c0_7 = arith.constant 0 : index
    %9 = vector.load %arg4[%c2, %c0_7] : memref<4x256xf32, #tpu.memory_space<vmem>>, vector<1x256xf32>
    %c3 = arith.constant 3 : index
    %c0_8 = arith.constant 0 : index
    %10 = vector.load %arg4[%c3, %c0_8] : memref<4x256xf32, #tpu.memory_space<vmem>>, vector<1x256xf32>
    %11 = vector.broadcast %10 : vector<1x256xf32> to vector<8x256xf32>
    %12 = arith.mulf %6, %11 : vector<8x256xf32>
    %13 = vector.broadcast %7 : vector<1x256xf32> to vector<8x256xf32>
    %14 = arith.addf %12, %13 : vector<8x256xf32>
    %cst_9 = arith.constant 0.000000e+00 : f32
    %15 = vector.broadcast %cst_9 : f32 to vector<8x256xf32>
    %16 = arith.maximumf %14, %15 : vector<8x256xf32>
    %cst_10 = arith.constant dense<0.000000e+00> : vector<256xf32>
    %17 = vector.multi_reduction <add>, %16, %cst_10 [0] : vector<8x256xf32> to vector<256xf32>
    %18 = vector.shape_cast %17 : vector<256xf32> to vector<1x256xf32>
    %cst_11 = arith.constant 1.250000e-01 : f32
    %19 = vector.broadcast %cst_11 : f32 to vector<1x256xf32>
    %20 = arith.mulf %18, %19 : vector<1x256xf32>
    %21 = vector.broadcast %20 : vector<1x256xf32> to vector<8x256xf32>
    %22 = arith.subf %16, %21 : vector<8x256xf32>
    %23 = arith.mulf %22, %22 : vector<8x256xf32>
    %cst_12 = arith.constant dense<0.000000e+00> : vector<256xf32>
    %24 = vector.multi_reduction <add>, %23, %cst_12 [0] : vector<8x256xf32> to vector<256xf32>
    %25 = vector.shape_cast %24 : vector<256xf32> to vector<1x256xf32>
    %cst_13 = arith.constant 1.250000e-01 : f32
    %26 = vector.broadcast %cst_13 : f32 to vector<1x256xf32>
    %27 = arith.mulf %25, %26 : vector<1x256xf32>
    %cst_14 = arith.constant 9.99999974E-6 : f32
    %28 = vector.broadcast %cst_14 : f32 to vector<1x256xf32>
    %29 = arith.addf %27, %28 : vector<1x256xf32>
    %30 = math.rsqrt %29 : vector<1x256xf32>
    %31 = arith.mulf %8, %30 : vector<1x256xf32>
    %32 = vector.broadcast %31 : vector<1x256xf32> to vector<8x256xf32>
    %33 = arith.mulf %22, %32 : vector<8x256xf32>
    %34 = vector.broadcast %9 : vector<1x256xf32> to vector<8x256xf32>
    %35 = arith.addf %33, %34 : vector<8x256xf32>
    %c1_15 = arith.constant 1 : index
    %c0_16 = arith.constant 0 : index
    %36 = vector.load %arg6[%c1_15, %c0_16] : memref<2x256xf32, #tpu.memory_space<vmem>>, vector<1x256xf32>
    %c0_17 = arith.constant 0 : index
    %c0_18 = arith.constant 0 : index
    %37 = vector.load %arg7[%c0_17, %c0_18] : memref<8x256xf32, #tpu.memory_space<vmem>>, vector<8x256xf32>
    %38 = arith.truncf %35 : vector<8x256xf32> to vector<8x256xbf16>
    %c0_19 = arith.constant 0 : index
    %c0_20 = arith.constant 0 : index
    %39 = vector.load %arg5[%c0_19, %c0_20] : memref<256x256xi8, #tpu.memory_space<vmem>>, vector<256x256xi8>
    %40 = arith.sitofp %39 : vector<256x256xi8> to vector<256x256xbf16>
    %cst_21 = arith.constant dense<0.000000e+00> : vector<8x256xf32>
    %41 = tpu.matmul %38, %40, %cst_21 {dimension_numbers = #tpu.dot_dimension_numbers<[1], [0], [0], [1], [0, 0, 1, 1], [], []>} : vector<8x256xbf16>, vector<256x256xbf16>, vector<8x256xf32> -> vector<8x256xf32>
    %42 = vector.broadcast %36 : vector<1x256xf32> to vector<8x256xf32>
    %43 = arith.mulf %42, %41 : vector<8x256xf32>
    %44 = arith.addf %37, %43 : vector<8x256xf32>
    %c0_22 = arith.constant 0 : index
    %c0_23 = arith.constant 0 : index
    %45 = vector.load %arg7[%c0_22, %c0_23] : memref<8x256xf32, #tpu.memory_space<vmem>>, vector<8x256xf32>
    tpu.vector_store %arg7[%c0_22, %c0_23], %44 {strides = array<i32>} : memref<8x256xf32, #tpu.memory_space<vmem>>, vector<8x256xf32>,
    %c1_i32 = arith.constant 1 : i32
    %46 = arith.cmpi eq, %arg1, %c1_i32 : i32
    %47 = arith.extui %46 : i1 to i32
    %c0_i32_24 = arith.constant 0 : i32
    %48 = arith.cmpi ne, %47, %c0_i32_24 : i32
    scf.if %48 {
      %c0_25 = arith.constant 0 : index
      %c0_26 = arith.constant 0 : index
      %49 = vector.load %arg7[%c0_25, %c0_26] : memref<8x256xf32, #tpu.memory_space<vmem>>, vector<8x256xf32>
      %c0_27 = arith.constant 0 : index
      %c0_28 = arith.constant 0 : index
      %50 = vector.load %arg6[%c0_27, %c0_28] : memref<2x256xf32, #tpu.memory_space<vmem>>, vector<1x256xf32>
      %51 = vector.broadcast %50 : vector<1x256xf32> to vector<8x256xf32>
      %52 = arith.addf %49, %51 : vector<8x256xf32>
      %cst_29 = arith.constant 0.000000e+00 : f32
      %53 = vector.broadcast %cst_29 : f32 to vector<8x256xf32>
      %54 = arith.subf %53, %52 : vector<8x256xf32>
      %55 = math.exp %54 : vector<8x256xf32>
      %cst_30 = arith.constant 1.000000e+00 : f32
      %56 = vector.broadcast %cst_30 : f32 to vector<8x256xf32>
      %57 = arith.addf %56, %55 : vector<8x256xf32>
      %cst_31 = arith.constant 1.000000e+00 : f32
      %58 = vector.broadcast %cst_31 : f32 to vector<8x256xf32>
      %59 = arith.divf %58, %57 : vector<8x256xf32>
      %c0_32 = arith.constant 0 : index
      %c0_33 = arith.constant 0 : index
      %60 = vector.load %arg7[%c0_32, %c0_33] : memref<8x256xf32, #tpu.memory_space<vmem>>, vector<8x256xf32>
      tpu.vector_store %arg7[%c0_32, %c0_33], %59 {strides = array<i32>} : memref<8x256xf32, #tpu.memory_space<vmem>>, vector<8x256xf32>,
    } else {
    }
    return
  }
  func.func @transform_0(%arg0: i32, %arg1: i32) -> (i32, i32) {
    %c0_i32 = arith.constant 0 : i32
    %c0_i32_0 = arith.constant 0 : i32
    %c0_i32_1 = arith.constant 0 : i32
    return %c0_i32, %c0_i32_0 : i32, i32
  }
  func.func @transform_1(%arg0: i32, %arg1: i32) -> (i32, i32) {
    %c0_i32 = arith.constant 0 : i32
    %c0_i32_0 = arith.constant 0 : i32
    return %c0_i32, %arg1 : i32, i32
  }
  func.func @transform_2(%arg0: i32, %arg1: i32) -> (i32, i32) {
    %c0_i32 = arith.constant 0 : i32
    %c0_i32_0 = arith.constant 0 : i32
    return %c0_i32, %arg1 : i32, i32
  }
  func.func @transform_3(%arg0: i32, %arg1: i32) -> (i32, i32) {
    %c0_i32 = arith.constant 0 : i32
    return %arg1, %arg0 : i32, i32
  }
  func.func @transform_4(%arg0: i32, %arg1: i32) -> (i32, i32) {
    %c0_i32 = arith.constant 0 : i32
    %c0_i32_0 = arith.constant 0 : i32
    return %c0_i32, %arg0 : i32, i32
  }
  func.func @transform_5(%arg0: i32, %arg1: i32) -> (i32, i32) {
    %c0_i32 = arith.constant 0 : i32
    %c0_i32_0 = arith.constant 0 : i32
    return %c0_i32, %arg0 : i32, i32
  }
}

</mosaic_0001>

<bundles_post_ra>
// kernel: tpu_custom_call.1
= control target key start
LH: loop header
LB: loop body
LE: loop exit
PB: predicated region body
PF: predicated region fallthrough
CT: control target
= control target key end

     0   :  { %s1492_s0 = inlined_call_operand.hbm [shape: bf16[8,256], index: 0, kind: input, shape index: {}]   ;;  %s1493_s1 = inlined_call_operand.hbm [shape: s8[256,512], index: 1, kind: input, shape index: {}]   ;;  %s1494_s2 = inlined_call_operand.hbm [shape: f32[4,512], index: 2, kind: input, shape index: {}]   ;;  %s1495_s3 = inlined_call_operand.hbm [shape: s8[512,256], index: 3, kind: input, shape index: {}]   ;;  %s1496_s4 = inlined_call_operand.vmem [shape: f32[2,256], index: 4, kind: input, shape index: {}]   ;;  %s1497_s5 = inlined_call_operand.hbm [shape: f32[8,256], index: 5, kind: output, shape index: {}]  }
   0x1   :  { %1504 = sst [smem:[#allocation15_spill]] %s1492_s0 }
   0x2   :  { %10 = vsyncpa [#allocation3], 0 }
   0x3   :  { %11 = vsyncpa [#allocation6], 0 }
   0x4   :  { %13 = vsyncpa [#allocation6 + $0x1], 0 }
   0x5   :  { %14 = vsyncpa [#allocation9], 0 }
   0x6   :  { %16 = vsyncpa [#allocation9 + $0x1], 0 }
   0x7   :  { %17 = vsyncpa [#allocation4], 0  ;;  %s1253_s18 = smov 0   ;;  %s1255_s19 = smov 0  }
   0x8   :  { %s1257_s20 = smov 0   ;;  %s1259_s21 = smov 0  }
   0x9   :  { %s1261_s22 = smov 0   ;;  %s1263_s23 = smov 0  }
   0xa LB: > { %s32_s24 = sadd.s32 1, %s1207_s22  ;;  %s63_s25 = sadd.s32 1, %s1199_s20  ;;  %s1211_s23 = sphi %s1263_s23, %s23_s23   ;;  %s1207_s22 = sphi %s1261_s22, %s1520_s22   ;;  %s1203_s21 = sphi %s1259_s21, %s1519_s21   ;;  %s1199_s20 = sphi %s1257_s20, %s1518_s20   ;;  %s1195_s19 = sphi %s1255_s19, %s1517_s19   ;;  %s1191_s18 = sphi %s1253_s18, %s1516_s18  }
   0xb   : > { %p33_p0 = scmp.ge.s32.totalorder %s32_s24, 2  ;;  %p70_p1 = scmp.ne.s32.totalorder %s1199_s20, %s1195_s19 }
   0xc   : > { %p71_p2 = scmp.eq.s32.totalorder %s1211_s23, 0  ;;  %p942_p4 = scmp.lt.s32.totalorder %s1211_s23, 2 }
   0xd   : > { %s1522_s24 = smov (%p33_p0, %s32_s24), 0  ;;  %s226_s27 = sand.u32 1, %s1211_s23  }
   0xe   : > { %p72_p3 = por %p71_p2, %p70_p1  ;;  %s60_s26 = ssub.s32 %s1207_s22, %s1522_s24 }
   0xf   : > { %p61_p5 = scmp.eq.s32.totalorder %s60_s26, 0  ;;  %s1295_s28 = sand.u32 1, %s1199_s20  }
  0x10   : > { %s909_s29 = sshll.u32 %s1207_s22, 8  ;;  %s882_s6 = sshll.u32 %s1295_s28, 7 }
  0x11   : > { %s1299_s30 = scalar_select %p61_p5, %s1199_s20, %s63_s25  }
  0x12   : > { %s236_s9 = scalar_lea.hbm %s1493_s1, %s909_s29  ;;  %p1305_p6 = pnand %p942_p4, %p72_p3 }
  0x13   : > { %s230_s11 = scalar_lea.vmem [#allocation5], %s882_s6  ;;  %s1311_s13 = scalar_lea.sflag [#allocation6], %s226_s27 }
  0x14   : > { %s237_s12 = sshll.u32 %s230_s11, 4  ;;  %p1499_p7 = pneg %p1305_p6  ;;  %s238_s12 = int_to_ptr.vmem [resolvable:$true] %s237_s12 }
  0x15   : > { %s1028_s14 = scalar_lea.vmem %s238_s12, 2048  ;;  %s1213_s15 = smov [#allocation5]  }
  0x16   : > { %p1029_p8 = scmp.ne.s32.totalorder %s238_s12, %s1028_s14  ;;  %s1033_s16 = sshll.u32 %s1213_s15, 4  ;;  %s1034_s16 = int_to_ptr.vmem [resolvable:$false] %s1033_s16 }
  0x17   : > { %s1035_s17 = scalar_lea.vmem %s1034_s16, 4096  ;;  %p1036_p11 = scmp.lt.s32.totalorder %s238_s12, %s1034_s16 }
  0x18   : > { %p1031_p9 = pnand %p1029_p8, %p1499_p7  ;;  %p1037_p12 = scmp.lt.s32.totalorder %s1035_s17, %s1028_s14 }
  0x1a   : > { %p1032_p10 = pneg %p1031_p9  ;;  %p1038_p13 = por %p1037_p12, %p1036_p11 }
  0x1c   : > { %p1039_p0 = pnand %p1038_p13, %p1032_p10 }
  0x1e   : > { %1042 = shalt.err (!%p1039_p0)
}
  0x1f   : > { %s1214_s25 = smov 512   ;;  %s1498_s26 = smov 256  }
  0x20   : > { %s1503_s27 = smov 16   ;;  %s1324_s29 = sadd.s32 4294967295, %s1211_s23  }
  0x21   : > { %934 = dma.hbm_to_vmem [thread:$0]  (!%p1305_p6), %s236_s9, 2048, %s238_s12, %s1311_s13, %s1214_s25, %s1498_s26, %s1503_s27  }
  0x22   : > { %p76_p1 = scmp.ne.s32.totalorder %s1195_s19, %s1191_s18  ;;  %p1500_p2 = scmp.eq.s32.totalorder %s1324_s29, 0 }
  0x23   : > { %p878_p3 = scmp.ge.s32.totalorder %s1211_s23, 1  ;;  %p193_p4 = scmp.lt.s32.totalorder %s1211_s23, 3 }
  0x24   : > { %p1333_p5 = por %p1500_p2, %p76_p1  ;;  %s1217_s9 = smov [#allocation2]  }
  0x25   : > { %p1337_p8 = pnand %p878_p3, %p193_p4  ;;  %s206_s11 = sshll.u32 %s1217_s9, 4  ;;  %s207_s11 = int_to_ptr.vmem [resolvable:$true] %s206_s11 }
  0x26   : > { %s1506_s7 = scalar_select %p1333_p5, 1, 0 }
  0x27   : > { %s1507_s8 = scalar_select %p1337_p8, 1, 0 }
  0x28   : > { %s885_s12 = sshll.u32 %s1295_s28, 3  ;;  %p927_p9 = pneg %p1337_p8 }
  0x29   : > { %s910_s18 = sshll.u32 %s1207_s22, 7  ;;  %s251_s14 = scalar_lea.vmem [#allocation7], %s885_s12 }
  0x2a   : > { %s259_s15 = sshll.u32 %s251_s14, 4  ;;  %p928_p10 = pnand %p927_p9, %p1500_p2  ;;  %s260_s15 = int_to_ptr.vmem [resolvable:$true] %s259_s15 }
  0x2b   : > { %s257_s25 = scalar_lea.hbm %s1494_s2, %s910_s18  ;;  %s1054_s26 = scalar_lea.vmem %s207_s11, 128 }
  0x2c   : > { %p1045_p11 = pneg %p928_p10  ;;  %p1055_p12 = scmp.ne.s32.totalorder %s207_s11, %s1054_s26 }
  0x2d   : > { %p1062_p1 = scmp.lt.s32.totalorder %s207_s11, %s207_s11  ;;  %p1063_p3 = scmp.lt.s32.totalorder %s1054_s26, %s1054_s26 }
  0x2e   : > { %p1057_p13 = pnand %p1055_p12, %p1045_p11 }
  0x2f   : > { %p1064_p4 = por %p1063_p3, %p1062_p1 }
  0x30   : > { %p1058_p0 = pneg %p1057_p13 }
  0x32   : > { %p1065_p7 = pnand %p1064_p4, %p1058_p0 }
  0x34   : > { %1068 = shalt.err (!%p1065_p7)
}
  0x35   : > { %s1508_s0 = sld [smem:[#allocation15_spill]]  ;;  %s1082_s14 = scalar_lea.vmem %s260_s15, 128 }
  0x36   : > { %p1083_p9 = scmp.ne.s32.totalorder %s260_s15, %s1082_s14  ;;  %p1509_p2 = pneg %p1305_p6 }
  0x37   : > { %s1218_s18 = smov [#allocation7]  }
  0x38   : > { %p1085_p5 = pnand %p1083_p9, %p1509_p2  ;;  %s1087_s16 = sshll.u32 %s1218_s18, 4  ;;  %s1088_s16 = int_to_ptr.vmem [resolvable:$false] %s1087_s16 }
  0x39   : > { %s1089_s17 = scalar_lea.vmem %s1088_s16, 256  ;;  %p1090_p11 = scmp.lt.s32.totalorder %s260_s15, %s1088_s16 }
  0x3a   : > { %p1086_p8 = pneg %p1085_p5  ;;  %p1091_p12 = scmp.lt.s32.totalorder %s1089_s17, %s1082_s14 }
  0x3b   : > { %930 = dma.hbm_to_vmem [thread:$0]  (!%p928_p10), %s1508_s0, 128, %s207_s11, [#allocation3]  }
  0x3c   : > { %p1092_p13 = por %p1091_p12, %p1090_p11 }
  0x3e   : > { %p1093_p0 = pnand %p1092_p13, %p1086_p8 }
  0x40   : > { %1096 = shalt.err (!%p1093_p0)
}
  0x41   : > { %937 = dma.hbm_to_vmem [thread:$0]  (!%p1305_p6), %s257_s25, 128, %s260_s15, %s1311_s13  }
  0x42   : > { %s912_s26 = sshll.u32 %s1207_s22, 11  ;;  %s270_s11 = scalar_lea.vmem [#allocation8], %s882_s6 }
  0x43   : > { %s280_s9 = sshll.u32 %s270_s11, 4  ;;  %s279_s16 = scalar_lea.hbm %s1495_s3, %s912_s26  ;;  %s281_s9 = int_to_ptr.vmem [resolvable:$true] %s280_s9 }
  0x44   : > { %s267_s14 = scalar_lea.sflag [#allocation9], %s1295_s28  ;;  %s1110_s17 = scalar_lea.vmem %s281_s9, 2048 }
  0x45   : > { %p1111_p7 = scmp.ne.s32.totalorder %s281_s9, %s1110_s17  ;;  %s1219_s27 = smov [#allocation8]  }
  0x46   : > { %s1115_s0 = sshll.u32 %s1219_s27, 4  ;;  %s1116_s0 = int_to_ptr.vmem [resolvable:$false] %s1115_s0 }
  0x47   : > { %p1113_p5 = pnand %p1111_p7, %p1509_p2  ;;  %s1117_s13 = scalar_lea.vmem %s1116_s0, 4096 }
  0x48   : > { %p1118_p10 = scmp.lt.s32.totalorder %s281_s9, %s1116_s0  ;;  %p1119_p1 = scmp.lt.s32.totalorder %s1117_s13, %s1110_s17 }
  0x49   : > { %p1114_p8 = pneg %p1113_p5 }
  0x4a   : > { %p1120_p3 = por %p1119_p1, %p1118_p10 }
  0x4c   : > { %p1121_p4 = pnand %p1120_p3, %p1114_p8 }
  0x4e   : > { %1124 = shalt.err (!%p1121_p4)
}
  0x4f   : > { %s1510_s6 = smov 16   ;;  %s1511_s15 = smov 256  }
  0x50   : > { %940 = dma.hbm_to_vmem [thread:$0]  (!%p1305_p6), %s279_s16, 2048, %s281_s9, %s267_s14, %s1511_s15, %s1511_s15, %s1510_s6  }
  0x51   : > { %p1512_p9 = scmp.ne.s32.totalorder %s1507_s8, 0 }
  0x52   : > { %p1513_p11 = scmp.eq.s32.totalorder (!%p1512_p9), %s1324_s29, 0 }
  0x53   : > { %292 = sbr.rel (%p1512_p9) target bundleno = 698 (0x2ba), region = 40 }
  0x58   : > { %1174 = dma.done.wait (%p1513_p11), [#allocation3], 128   ;;  %p1514_p12 = pmov %p1513_p11 }
  0x59   : > { %s298_s0 = sand.u32 1, %s1324_s29   ;;  %s300_s28 = sand.u32 1, %s1195_s19  }
  0x5a   : > { %1176 = vsyncadd (%p1514_p12), [#allocation3], 4294967168  ;;  %s894_s27 = sshll.u32 %s300_s28, 7  ;;  %s299_s10 = scalar_lea.sflag [#allocation6], %s298_s0 }
  0x5b   : > { %s1382_s25 = scalar_lea.vmem [#allocation5], %s894_s27  ;;  %p1515_p13 = scmp.ne.s32.totalorder %s1506_s7, 0 }
  0x5d   : > { %1178 = dma.done.wait (%p1515_p13), %s299_s10, 2176  }
  0x5e   : > { %1180 = vsyncadd (%p1515_p13), %s299_s10, 4294965120  ;;  %s895_s8 = sshll.u32 %s300_s28, 3  ;;  %s317_s11 = scalar_lea.sflag [#allocation9], %s300_s28 }
  0x5f   : > { %s1388_s26 = scalar_lea.vmem [#allocation7], %s895_s8  ;;  %s1390_s9 = scalar_lea.vmem [#allocation8], %s894_s27 }
  0x60   : > { %1182 = dma.done.wait (%p1515_p13), %s317_s11, 2048  }
  0x61   : > { %1184 = vsyncadd (%p1515_p13), %s317_s11, 4294965248  ;;  %p897_p6 = scmp.ne.s32.totalorder %s1203_s21, 0 }
  0x63   : > { %371 = sbr.rel (%p897_p6) target bundleno = 106 (0x6a), region = 60 }
  0x68   : > { %v1220_v0 = vmov 0.0  }
  0x69   : > { %372 = vst [vmem:[#allocation10] sm:$0xff] %v1220_v0  ;;  %373 = vst [vmem:[#allocation10 + $0x8] sm:$0xff] %v1220_v0 }
  0x6a PF: > { %v382_v1 = vld [vmem:[%s1382_s25 + $0x38] sm:$0xff]  ;;  %v381_v2 = vld [vmem:[%s1382_s25 + $0x30] sm:$0xff]  ;;  %v380_v6 = vld [vmem:[%s1382_s25 + $0x28] sm:$0xff]  ;;  %p904_p0 = scmp.ne.s32.totalorder %s1203_s21, 1 }
  0x6b   : > { %v404_v3 = vunpack.c.l.s8.bf16 %v382_v1  ;;  %v406_v4 = vunpack.c.h.s8.bf16 %v382_v1  ;;  %v405_v5 = vunpack.c.h.s8.bf16 %v381_v2  ;;  %v403_v7 = vunpack.c.l.s8.bf16 %v381_v2  ;;  %v379_v9 = vld [vmem:[%s1382_s25 + $0x20] sm:$0xff]  ;;  %v1401_v10 = vld [vmem:[#allocation2] sm:$0xff]  ;;  %v377_v17 = vld [vmem:[%s1382_s25 + $0x10] sm:$0xff] }
  0x6c   : > { %v402_v8 = vunpack.c.h.s8.bf16 %v380_v6  ;;  %v401_v11 = vunpack.c.h.s8.bf16 %v379_v9  ;;  %v400_v12 = vunpack.c.l.s8.bf16 %v380_v6  ;;  %v899_v13 = vcombine.high %v1401_v10, %v1401_v10  ;;  %v378_v14 = vld [vmem:[%s1382_s25 + $0x18] sm:$0xff]  ;;  %v376_v20 = vld [vmem:[%s1382_s25 + $0x8] sm:$0xff]  ;;  %v375_v23 = vld [vmem:[%s1382_s25] sm:$0xff] }
  0x6d   : > { %430 = vmatprep.subr.bf16.mxu0 %v406_v4  ;;  %v399_v15 = vunpack.c.l.s8.bf16 %v379_v9  ;;  %v398_v16 = vunpack.c.h.s8.bf16 %v378_v14  ;;  %v397_v18 = vunpack.c.h.s8.bf16 %v377_v17  ;;  %v396_v19 = vunpack.c.l.s8.bf16 %v378_v14  ;;  %v390_v26 = vld [vmem:[%s1382_s25 + $0x78] sm:$0xff]  ;;  %v389_v29 = vld [vmem:[%s1382_s25 + $0x70] sm:$0xff]  ;;  %v388_v32 = vld [vmem:[%s1382_s25 + $0x68] sm:$0xff] }
  0x6e   : > { %431 = vmatpush1.bf16.msra.mxu0 %v405_v5  ;;  %462 = vmatprep.mubr.bf16.mxu0 %v899_v13  ;;  %v395_v21 = vunpack.c.l.s8.bf16 %v377_v17  ;;  %v394_v22 = vunpack.c.h.s8.bf16 %v376_v20  ;;  %v393_v24 = vunpack.c.h.s8.bf16 %v375_v23  ;;  %v392_v25 = vunpack.c.l.s8.bf16 %v376_v20  ;;  %v387_v35 = vld [vmem:[%s1382_s25 + $0x60] sm:$0xff]  ;;  %v386_v38 = vld [vmem:[%s1382_s25 + $0x58] sm:$0xff]  ;;  %v385_v41 = vld [vmem:[%s1382_s25 + $0x50] sm:$0xff] }
  0x6f   : > { %432 = vmatprep.subr.bf16.mxu0 %v404_v3  ;;  %v391_v27 = vunpack.c.l.s8.bf16 %v375_v23  ;;  %v422_v28 = vunpack.c.h.s8.bf16 %v390_v26  ;;  %v421_v30 = vunpack.c.h.s8.bf16 %v389_v29  ;;  %v420_v31 = vunpack.c.l.s8.bf16 %v390_v26  ;;  %v384_v44 = vld [vmem:[%s1382_s25 + $0x48] sm:$0xff]  ;;  %v383_v47 = vld [vmem:[%s1382_s25 + $0x40] sm:$0xff]  ;;  %v598_v58 = vld [vmem:[%s1390_s9 + $0x28] sm:$0xff] }
  0x70   : > { %v419_v33 = vunpack.c.l.s8.bf16 %v389_v29  ;;  %v418_v34 = vunpack.c.h.s8.bf16 %v388_v32  ;;  %v417_v36 = vunpack.c.h.s8.bf16 %v387_v35  ;;  %v416_v37 = vunpack.c.l.s8.bf16 %v388_v32  ;;  %v600_v52 = vld [vmem:[%s1390_s9 + $0x38] sm:$0xff]  ;;  %v599_v54 = vld [vmem:[%s1390_s9 + $0x30] sm:$0xff]  ;;  %v597_v60 = vld [vmem:[%s1390_s9 + $0x20] sm:$0xff] }
  0x71   : > { %v415_v39 = vunpack.c.l.s8.bf16 %v387_v35  ;;  %v414_v40 = vunpack.c.h.s8.bf16 %v386_v38  ;;  %v413_v42 = vunpack.c.h.s8.bf16 %v385_v41  ;;  %v412_v43 = vunpack.c.l.s8.bf16 %v386_v38  ;;  %v596_v0 = vld [vmem:[%s1390_s9 + $0x18] sm:$0xff]  ;;  %v595_v2 = vld [vmem:[%s1390_s9 + $0x10] sm:$0xff]  ;;  %v594_v6 = vld [vmem:[%s1390_s9 + $0x8] sm:$0xff] }
  0x72   : > { %433 = vmatpush1.bf16.msra.mxu0 %v403_v7  ;;  %v411_v45 = vunpack.c.l.s8.bf16 %v385_v41  ;;  %v410_v46 = vunpack.c.h.s8.bf16 %v384_v44  ;;  %v409_v48 = vunpack.c.h.s8.bf16 %v383_v47  ;;  %v408_v49 = vunpack.c.l.s8.bf16 %v384_v44  ;;  %v607_v14 = vld [vmem:[%s1390_s9 + $0x70] sm:$0xff]  ;;  %v606_v17 = vld [vmem:[%s1390_s9 + $0x68] sm:$0xff]  ;;  %v605_v20 = vld [vmem:[%s1390_s9 + $0x60] sm:$0xff] }
  0x73   : > { %434 = vmatprep.subr.bf16.mxu0 %v402_v8  ;;  %v407_v50 = vunpack.c.l.s8.bf16 %v383_v47  ;;  %v898_v51 = vcombine.low %v1401_v10, %v1401_v10  ;;  %v624_v53 = vunpack.c.h.s8.bf16 %v600_v52  ;;  %v623_v55 = vunpack.c.h.s8.bf16 %v599_v54  ;;  %v593_v8 = vld [vmem:[%s1390_s9] sm:$0xff]  ;;  %v604_v23 = vld [vmem:[%s1390_s9 + $0x58] sm:$0xff]  ;;  %v603_v26 = vld [vmem:[%s1390_s9 + $0x50] sm:$0xff] }
  0x74   : > { %v622_v56 = vunpack.c.l.s8.bf16 %v600_v52  ;;  %v621_v57 = vunpack.c.l.s8.bf16 %v599_v54  ;;  %v620_v59 = vunpack.c.h.s8.bf16 %v598_v58  ;;  %v619_v61 = vunpack.c.h.s8.bf16 %v597_v60  ;;  %v602_v29 = vld [vmem:[%s1390_s9 + $0x48] sm:$0xff]  ;;  %v601_v32 = vld [vmem:[%s1390_s9 + $0x40] sm:$0xff]  ;;  %v471_v41 = vld [vmem:[%s1388_s26] ss:$4 sm:$0x3] }
  0x75   : > { %641 = vmatprep.subr.bf16.mxu1 %v624_v53  ;;  %v618_v62 = vunpack.c.l.s8.bf16 %v598_v58  ;;  %v617_v63 = vunpack.c.l.s8.bf16 %v597_v60  ;;  %v616_v1 = vunpack.c.h.s8.bf16 %v596_v0  ;;  %v615_v3 = vunpack.c.h.s8.bf16 %v595_v2 }
  0x76   : > { %435 = vmatpush1.bf16.msra.mxu0 %v401_v11  ;;  %642 = vmatpush1.bf16.msra.mxu1 %v623_v55  ;;  %v614_v4 = vunpack.c.l.s8.bf16 %v596_v0  ;;  %v613_v5 = vunpack.c.l.s8.bf16 %v595_v2  ;;  %v612_v7 = vunpack.c.h.s8.bf16 %v594_v6  ;;  %v611_v9 = vunpack.c.h.s8.bf16 %v593_v8 }
  0x77   : > { %436 = vmatprep.subr.bf16.mxu0 %v400_v12  ;;  %643 = vmatprep.subr.bf16.mxu1 %v622_v56  ;;  %v610_v10 = vunpack.c.l.s8.bf16 %v594_v6  ;;  %v609_v11 = vunpack.c.l.s8.bf16 %v593_v8  ;;  %v608_v12 = vld [vmem:[%s1390_s9 + $0x78] sm:$0xff]  ;;  %v625_v35 = vunpack.c.l.s8.bf16 %v601_v32 }
  0x78   : > { %v640_v13 = vunpack.c.h.s8.bf16 %v608_v12 }
  0x7a   : > { %437 = vmatpush1.bf16.msra.mxu0 %v399_v15  ;;  %644 = vmatpush1.bf16.msra.mxu1 %v621_v57  ;;  %v639_v15 = vunpack.c.h.s8.bf16 %v607_v14 }
  0x7b   : > { %438 = vmatprep.subr.bf16.mxu0 %v398_v16  ;;  %645 = vmatprep.subr.bf16.mxu1 %v620_v59  ;;  %v638_v16 = vunpack.c.l.s8.bf16 %v608_v12 }
  0x7e   : > { %439 = vmatpush1.bf16.msra.mxu0 %v397_v18  ;;  %646 = vmatpush1.bf16.msra.mxu1 %v619_v61  ;;  %v637_v18 = vunpack.c.l.s8.bf16 %v607_v14 }
  0x7f   : > { %440 = vmatprep.subr.bf16.mxu0 %v396_v19  ;;  %647 = vmatprep.subr.bf16.mxu1 %v618_v62  ;;  %v636_v19 = vunpack.c.h.s8.bf16 %v606_v17 }
  0x82   : > { %441 = vmatpush1.bf16.msra.mxu0 %v395_v21  ;;  %648 = vmatpush1.bf16.msra.mxu1 %v617_v63  ;;  %v635_v21 = vunpack.c.h.s8.bf16 %v605_v20 }
  0x83   : > { %442 = vmatprep.subr.bf16.mxu0 %v394_v22  ;;  %649 = vmatprep.subr.bf16.mxu1 %v616_v1  ;;  %v634_v22 = vunpack.c.l.s8.bf16 %v606_v17 }
  0x86   : > { %443 = vmatpush1.bf16.msra.mxu0 %v393_v24  ;;  %650 = vmatpush1.bf16.msra.mxu1 %v615_v3  ;;  %v633_v24 = vunpack.c.l.s8.bf16 %v605_v20 }
  0x87   : > { %444 = vmatprep.subr.bf16.mxu0 %v392_v25  ;;  %651 = vmatprep.subr.bf16.mxu1 %v614_v4  ;;  %v632_v25 = vunpack.c.h.s8.bf16 %v604_v23 }
  0x8a   : > { %445 = vmatpush1.bf16.msra.mxu0 %v391_v27  ;;  %652 = vmatpush1.bf16.msra.mxu1 %v613_v5  ;;  %v631_v27 = vunpack.c.h.s8.bf16 %v603_v26 }
  0x8b   : > { %446 = vmatprep.subr.bf16.mxu0 %v422_v28  ;;  %653 = vmatprep.subr.bf16.mxu1 %v612_v7  ;;  %v630_v28 = vunpack.c.l.s8.bf16 %v604_v23 }
  0x8e   : > { %447 = vmatpush2.bf16.msra.mxu0 %v421_v30  ;;  %654 = vmatpush1.bf16.msra.mxu1 %v611_v9  ;;  %v629_v30 = vunpack.c.l.s8.bf16 %v603_v26  ;;  %v1221_v26 = vmov 1966171168  }
  0x8f   : > { %448 = vmatprep.subr.bf16.mxu0 %v420_v31  ;;  %655 = vmatprep.subr.bf16.mxu1 %v610_v10  ;;  %v628_v31 = vunpack.c.h.s8.bf16 %v602_v29 }
  0x92   : > { %449 = vmatpush2.bf16.msra.mxu0 %v419_v33  ;;  %656 = vmatpush1.bf16.msra.mxu1 %v609_v11  ;;  %v627_v33 = vunpack.c.h.s8.bf16 %v601_v32 }
  0x93   : > { %450 = vmatprep.subr.bf16.mxu0 %v418_v34  ;;  %657 = vmatprep.subr.bf16.mxu1 %v640_v13  ;;  %v626_v34 = vunpack.c.l.s8.bf16 %v602_v29 }
  0x96   : > { %451 = vmatpush2.bf16.msra.mxu0 %v417_v36  ;;  %658 = vmatpush2.bf16.msra.mxu1 %v639_v15  ;;  %v479_v36 = vlaneseq }
  0x97   : > { %452 = vmatprep.subr.bf16.mxu0 %v416_v37  ;;  %659 = vmatprep.subr.bf16.mxu1 %v638_v16 }
  0x98   : > { %v480_v37 = vshrl.u32 %v479_v36, 7  ;;  %v901_v36 = vld [vmem:[%s1388_s26 + $0x2] ss:$4 sm:$0x3] }
  0x9a   : > { %453 = vmatpush2.bf16.msra.mxu0 %v415_v39  ;;  %660 = vmatpush2.bf16.msra.mxu1 %v637_v18  ;;  %v1435_v38 = vsub.s32 0, %v480_v37  ;;  %v902_v39 = vld [vmem:[%s1388_s26 + $0x3] ss:$4 sm:$0x3] }
  0x9b   : > { %454 = vmatprep.subr.bf16.mxu0 %v414_v40  ;;  %661 = vmatprep.subr.bf16.mxu1 %v636_v19  ;;  %v1438_v40 = vsub.s32 1, %v480_v37 }
  0x9d   : > { %v486_v44 = vrot.slane %v902_v39, %v1438_v40  ;;  %v499_v47 = vrot.slane %v471_v41, %v1438_v40 }
  0x9e   : > { %455 = vmatpush2.bf16.msra.mxu0 %v413_v42  ;;  %662 = vmatpush2.bf16.msra.mxu1 %v635_v21  ;;  %v482_v42 = vrot.slane %v902_v39, %v1435_v38 }
  0x9f   : > { %456 = vmatprep.subr.bf16.mxu0 %v412_v43  ;;  %663 = vmatprep.subr.bf16.mxu1 %v634_v22  ;;  %v495_v43 = vrot.slane %v471_v41, %v1435_v38 }
  0xa2   : > { %457 = vmatpush2.bf16.msra.mxu0 %v411_v45  ;;  %664 = vmatpush2.bf16.msra.mxu1 %v633_v24 }
  0xa3   : > { %458 = vmatprep.subr.bf16.mxu0 %v410_v46  ;;  %665 = vmatprep.subr.bf16.mxu1 %v632_v25 }
  0xa6   : > { %459 = vmatpush2.bf16.msra.mxu0 %v409_v48  ;;  %666 = vmatpush2.bf16.msra.mxu1 %v631_v27  ;;  %v546_v27 = vunpack.c.l.s4 %v1221_v26 }
  0xa7   : > { %460 = vmatprep.subr.bf16.mxu0 %v408_v49  ;;  %667 = vmatprep.subr.bf16.mxu1 %v630_v28 }
  0xa8   : > { %v547_v28 = vunpack.c.0.s8 %v546_v27 }
  0xaa   : > { %461 = vmatpush2.bf16.msra.mxu0 %v407_v50  ;;  %668 = vmatpush2.bf16.msra.mxu1 %v629_v30  ;;  %v550_v30 = vsub.s32 %v547_v28, %v480_v37 }
  0xab   : > { %669 = vmatprep.subr.bf16.mxu1 %v628_v31 }
  0xad   : > { %463 = vmatmul.mubr.bf16.vlgmr.msra.gmra.mxu0 %v898_v51 }
  0xae   : > { %670 = vmatpush2.bf16.msra.mxu1 %v627_v33 }
  0xaf   : > { %671 = vmatprep.subr.bf16.mxu1 %v626_v34  ;;  %v900_v34 = vld [vmem:[%s1388_s26 + $0x1] ss:$4 sm:$0x3] }
  0xb2   : > { %672 = vmatpush2.bf16.msra.mxu1 %v625_v35 }
 0x16d   : > { %v464_v45 = vpop.f32.mrf.mxu0 }
 0x16e   : > { %v489_v46 = vmul.f32 %v482_v42, %v464_v45  ;;  %v578_v42 = vrot.slane %v901_v36, %v1435_v38 }
 0x16f   : > { %v466_v48 = vpop.f32.mrf.mxu0 }
 0x170   : > { %v502_v49 = vadd.f32 %v495_v43, %v489_v46  ;;  %v490_v50 = vmul.f32 %v486_v44, %v466_v48  ;;  %v582_v43 = vrot.slane %v901_v36, %v1438_v40 }
 0x171   : > { %v468_v51 = vpop.f32.mrf.mxu0 }
 0x172   : > { %v504_v52 = vmax.f32 %v502_v49, 0.0  ;;  %v503_v53 = vadd.f32 %v499_v47, %v490_v50  ;;  %v903_v50 = vld [vmem:[%s1496_s4 + $0x1] ss:$2 sm:$0x3] }
 0x173   : > { %v469_v54 = vpop.f32.mrf.mxu0  ;;  %v686_v51 = vrot.slane %v903_v50, %v1435_v38 }
 0x174   : > { %v506_v55 = vrot.slane %v504_v52, 4  ;;  %v505_v56 = vmax.f32 %v503_v53, 0.0  ;;  %v589_v53 = vld [vmem:[#allocation10] sm:$0xff] }
 0x176   : > { %v507_v57 = vadd.f32 %v506_v55, %v504_v52  ;;  %v512_v58 = vrot.slane %v505_v56, 4 }
 0x178   : > { %v508_v59 = vrot.slane %v507_v57, 2  ;;  %v513_v60 = vadd.f32 %v512_v58, %v505_v56 }
 0x17a   : > { %v509_v61 = vadd.f32 %v508_v59, %v507_v57  ;;  %v514_v62 = vrot.slane %v513_v60, 2 }
 0x17c   : > { %v510_v63 = vrot.slane %v509_v61, 1  ;;  %v515_v0 = vadd.f32 %v514_v62, %v513_v60 }
 0x17e   : > { %v511_v1 = vadd.f32 %v510_v63, %v509_v61  ;;  %v516_v2 = vrot.slane %v515_v0, 1 }
 0x180   : > { %v518_v3 = vmul.f32 0.125, %v511_v1  ;;  %v517_v4 = vadd.f32 %v516_v2, %v515_v0 }
 0x182   : > { %v520_v5 = vsub.f32 %v504_v52, %v518_v3  ;;  %v519_v6 = vmul.f32 0.125, %v517_v4  ;;  %v690_v52 = vrot.slane %v903_v50, %v1438_v40 }
 0x184   : > { %v522_v7 = vmul.f32 %v520_v5, %v520_v5  ;;  %v521_v8 = vsub.f32 %v505_v56, %v519_v6  ;;  %v590_v56 = vld [vmem:[#allocation10 + $0x8] sm:$0xff] }
 0x186   : > { %v524_v9 = vrot.slane %v522_v7, 4  ;;  %v523_v10 = vmul.f32 %v521_v8, %v521_v8 }
 0x188   : > { %v525_v11 = vadd.f32 %v524_v9, %v522_v7  ;;  %v530_v12 = vrot.slane %v523_v10, 4 }
 0x18a   : > { %v526_v13 = vrot.slane %v525_v11, 2  ;;  %v531_v14 = vadd.f32 %v530_v12, %v523_v10 }
 0x18c   : > { %v527_v15 = vadd.f32 %v526_v13, %v525_v11  ;;  %v532_v16 = vrot.slane %v531_v14, 2 }
 0x18e   : > { %v528_v17 = vrot.slane %v527_v15, 1  ;;  %v533_v18 = vadd.f32 %v532_v16, %v531_v14 }
 0x190   : > { %v529_v19 = vadd.f32 %v528_v17, %v527_v15  ;;  %v534_v20 = vrot.slane %v533_v18, 1 }
 0x192   : > { %v536_v21 = vmul.f32 0.125, %v529_v19  ;;  %v535_v22 = vadd.f32 %v534_v20, %v533_v18 }
 0x194   : > { %v538_v23 = vadd.f32 1e-05, %v536_v21  ;;  %v537_v24 = vmul.f32 0.125, %v535_v22 }
 0x196   : > { %v539_v25 = vadd.f32 1e-05, %v537_v24  ;;  %1003 = vrsqrt.f32 %v538_v23 }
 0x198   : > { %1005 = vrsqrt.f32 %v539_v25 }
 0x1a3   : > { %v1004_v29 = vpop.eup %1003 }
 0x1a5   : > { %v1006_v31 = vpop.eup %1005 }
 0x1a6   : > { %v544_v32 = vcombine.low %v1004_v29, %v1006_v31 }
 0x1a8   : > { %v551_v33 = vrot.slane %v544_v32, %v550_v30 }
 0x1aa   : > { %v558_v35 = vrot.slane %v551_v33, %v550_v30 }
 0x1ac   : > { %v560_v39 = vmul.f32 %v900_v34, %v558_v35 }
 0x1ae   : > { %v569_v41 = vrot.slane %v560_v39, %v1438_v40  ;;  %v565_v44 = vrot.slane %v560_v39, %v1435_v38 }
 0x1b0   : > { %v573_v45 = vmul.f32 %v569_v41, %v521_v8  ;;  %v572_v46 = vmul.f32 %v565_v44, %v520_v5 }
 0x1b2   : > { %v586_v47 = vadd.f32 %v582_v43, %v573_v45  ;;  %v585_v48 = vadd.f32 %v578_v42, %v572_v46 }
 0x1b4   : > { %v592_v37 = vpack.c.bf16 %v586_v47, %v586_v47  ;;  %v591_v49 = vpack.c.bf16 %v585_v48, %v585_v48 }
 0x1b6   : > { %673 = vmatprep.mubr.bf16.mxu1 %v592_v37 }
 0x1b7   : > { %674 = vmatmul.mubr.bf16.vlgmr.msra.gmra.mxu1 %v591_v49 }
 0x277   : > { %v675_v54 = vpop.f32.mrf.mxu1 }
 0x278   : > { %v693_v55 = vmul.f32 %v686_v51, %v675_v54 }
 0x279   : > { %v677_v57 = vpop.f32.mrf.mxu1 }
 0x27a   : > { %v695_v58 = vadd.f32 %v693_v55, %v589_v53  ;;  %v694_v59 = vmul.f32 %v690_v52, %v677_v57  ;;  %702 = sbr.rel (%p904_p0) target bundleno = 683 (0x2ab), region = 64 }
 0x27b   : > { %v679_v60 = vpop.f32.mrf.mxu1 }
 0x27c   : > { %697 = vst [vmem:[#allocation10] sm:$0xff] %v695_v58  ;;  %v696_v61 = vadd.f32 %v694_v59, %v590_v56 }
 0x27d   : > { %v680_v62 = vpop.f32.mrf.mxu1 }
 0x27e   : > { %698 = vst [vmem:[#allocation10 + $0x8] sm:$0xff] %v696_v61 }
 0x27f   : > { %v705_v0 = vld [vmem:[%s1496_s4] ss:$2 sm:$0x3] }
 0x280   : > { %v710_v2 = vrot.slane %v705_v0, %v1435_v38  ;;  %v714_v3 = vrot.slane %v705_v0, %v1438_v40 }
 0x283   : > { %v703_v63 = vld [vmem:[#allocation10] sm:$0xff] }
 0x284   : > { %v717_v4 = vadd.f32 %v710_v2, %v703_v63 }
 0x285   : > { %v704_v1 = vld [vmem:[#allocation10 + $0x8] sm:$0xff] }
 0x286   : > { %v718_v5 = vadd.f32 %v714_v3, %v704_v1  ;;  %v719_v6 = vsub.f32 0.0, %v717_v4 }
 0x288   : > { %v720_v7 = vsub.f32 0.0, %v718_v5  ;;  %v721_v8 = vmul.f32 1.442695, %v719_v6 }
 0x28a   : > { %v723_v9 = vmul.f32 1.442695, %v720_v7  ;;  %1007 = vpow2.f32 %v721_v8 }
 0x28c   : > { %1009 = vpow2.f32 %v723_v9 }
 0x297   : > { %v1008_v10 = vpop.eup %1007 }
 0x298   : > { %v725_v12 = vadd.f32 1.0, %v1008_v10 }
 0x299   : > { %v1010_v11 = vpop.eup %1009 }
 0x29a   : > { %v726_v13 = vadd.f32 1.0, %v1010_v11  ;;  %1011 = vrcp.f32 %v725_v12 }
 0x29c   : > { %1013 = vrcp.f32 %v726_v13 }
 0x2a7   : > { %v1012_v14 = vpop.eup %1011 }
 0x2a8   : > { %731 = vst [vmem:[#allocation10] sm:$0xff] %v1012_v14 }
 0x2a9   : > { %v1014_v15 = vpop.eup %1013 }
 0x2aa   : > { %732 = vst [vmem:[#allocation10 + $0x8] sm:$0xff] %v1014_v15 }
 0x2ab PF: > { %p944_p7 = scmp.eq.s32.totalorder %s1324_s29, 1  ;;  %s1222_s21 = smov [#allocation10]  }
 0x2ac   : > { %s743_s14 = sshll.u32 %s1222_s21, 4  ;;  %s744_s14 = int_to_ptr.vmem [resolvable:$true] %s743_s14 }
 0x2ad   : > { %s1125_s17 = scalar_lea.vmem %s744_s14, 256  ;;  %p1132_p10 = scmp.lt.s32.totalorder %s744_s14, %s744_s14 }
 0x2ae   : > { %p1126_p2 = scmp.ne.s32.totalorder %s744_s14, %s1125_s17  ;;  %p1133_p1 = scmp.lt.s32.totalorder %s1125_s17, %s1125_s17 }
 0x2b0   : > { %p1127_p5 = pnand %p1126_p2, %p944_p7  ;;  %p1134_p3 = por %p1133_p1, %p1132_p10 }
 0x2b2   : > { %p1128_p8 = pneg %p1127_p5 }
 0x2b4   : > { %p1135_p4 = pnand %p1134_p3, %p1128_p8 }
 0x2b6   : > { %1138 = shalt.err (!%p1135_p4)
}
 0x2b7   : > { %924 = dma.vmem_to_hbm [thread:$0]  (%p944_p7), %s744_s14, 256, %s1497_s5, [#allocation4]  }
 0x2b8   : > { %1186 = dma.done.wait (%p944_p7), [#allocation4], 256  }
 0x2b9   : > { %1188 = vsyncadd (%p944_p7), [#allocation4], 4294967040 }
 0x2ba PF: > { %s23_s23 = sadd.s32 1, %s1211_s23   ;;  %s1516_s18 = smov %s1195_s19 }
 0x2bb   : > { %p20_p9 = scmp.ge.s32.totalorder %s23_s23, 4   ;;  %s1517_s19 = smov %s1199_s20 }
 0x2bc   : > { %s1518_s20 = smov %s1299_s30  ;;  %s1519_s21 = smov %s1207_s22 }
 0x2bd   : > { %s1520_s22 = smov %s1522_s24  ;;  %22 = sbr.rel (!%p20_p9) target bundleno = 10 (0xa), region = 122 }
 0x2c2   :  { %756 = vsyncpa [#allocation3], 1 }
 0x2c3   :  { %758 = vsyncpa [#allocation3 + $0x1], 1 }
 0x2c4   :  { %759 = vsyncpa [#allocation6], 1 }
 0x2c5   :  { %761 = vsyncpa [#allocation6 + $0x1], 1 }
 0x2c6   :  { %762 = vsyncpa [#allocation9], 1 }
 0x2c7   :  { %764 = vsyncpa [#allocation9 + $0x1], 1 }
 0x2c8   :  { %765 = vsyncpa [#allocation4], 1 }
 0x2c9   :  { %767 = vsyncpa [#allocation4 + $0x1], 1 }

</bundles_post_ra>
